<compile_context>
chip_gen: v7x
topology: tpu7x:2x2x1
jax: 0.10.0
libtpu: 0.0.40
codegen_flags: <defaults>
</compile_context>

<pallas_src>
import functools

import jax
import jax.numpy as jnp
from jax.experimental import pallas as pl
from jax.experimental.pallas import tpu as pltpu


def _round_up(n: int, m: int) -> int:
    return ((n + m - 1) // m) * m


# ---------------------------------------------------------------------------
# Pallas kernel: custom LayerNormalization
#   out = alpha * (x - mean) / (std + eps) + bias
#   mean/std over the last (hidden) dim; std uses Bessel's correction (N-1),
#   matching torch.Tensor.std; alpha and bias are learnable scalars.
# ---------------------------------------------------------------------------
def _layernorm_kernel(params_ref, x_ref, o_ref, *, eps, d_model):
    # params_ref: SMEM (2,) f32 -> [alpha, bias]
    # x_ref/o_ref: VMEM (tile_rows, d_model)
    x = x_ref[...].astype(jnp.float32)
    mean = jnp.mean(x, axis=-1, keepdims=True)
    centered = x - mean
    # torch's .std() is unbiased: divide by (D - 1).
    var = jnp.sum(centered * centered, axis=-1, keepdims=True) * (1.0 / (d_model - 1))
    std = jnp.sqrt(var)
    alpha = params_ref[0]
    bias = params_ref[1]
    y = centered * (alpha / (std + eps)) + bias
    o_ref[...] = y.astype(o_ref.dtype)


def _pick_tile_rows(n_rows, d_model, dtype_bytes, vmem_budget_bytes=16 * 1024 * 1024):
    # Double-buffered input + output tiles -> ~4 live (tile, D) buffers.
    per_row = 4 * d_model * max(dtype_bytes, 4)  # f32 compute upper bound
    tile = vmem_budget_bytes // max(per_row, 1)
    tile = max(8, min(tile, 1024))
    tile = (tile // 8) * 8                       # sublane (8) alignment
    tile = min(tile, _round_up(n_rows, 8))
    return max(tile, 8)


def layer_normalization(x, alpha, bias, *, eps=1e-6):
    """Pallas LayerNormalization.  x: (B, S, D); alpha/bias: python scalars."""
    B, S, D = x.shape
    R = B * S
    x2 = x.reshape(R, D)

    dtype_bytes = jnp.dtype(x.dtype).itemsize
    tile_r = _pick_tile_rows(R, D, dtype_bytes)
    Rp = _round_up(R, tile_r)
    if Rp != R:
        # Rows are independent -> zero-pad and slice off afterwards.
        x2 = jnp.pad(x2, ((0, Rp - R), (0, 0)))

    params = jnp.asarray([alpha, bias], dtype=jnp.float32)  # (2,) scalars -> SMEM

    kernel = functools.partial(_layernorm_kernel, eps=float(eps), d_model=D)

    out = pl.pallas_call(
        kernel,
        out_shape=jax.ShapeDtypeStruct((Rp, D), x.dtype),
        grid_spec=pltpu.PrefetchScalarGridSpec(
            num_scalar_prefetch=0,
            grid=(Rp // tile_r,),
            in_specs=[
                pl.BlockSpec(memory_space=pltpu.MemorySpace.SMEM),  # [alpha, bias]
                pl.BlockSpec((tile_r, D), lambda i: (i, 0)),        # x row tile
            ],
            out_specs=pl.BlockSpec((tile_r, D), lambda i: (i, 0)),
        ),
        compiler_params=pltpu.CompilerParams(
            dimension_semantics=("parallel",),  # row tiles are independent
        ),
    )(params, x2)

    return out[:R].reshape(B, S, D)


def encoder_forward(x, mask, layers=(), *, alpha=1.0, bias=0.0, eps=1e-6):
    """Encoder.forward: apply every layer, then the final LayerNormalization."""
    # TODO(synk): the encoder blocks in `self.layers` are opaque nn.Modules
    # passed to the constructor; here they are arbitrary plain-JAX callables
    # (identity stack in the demo) rather than Pallas translations.
    for layer in layers:
        x = layer(x, mask)
    return layer_normalization(x, alpha, bias, eps=eps)


if __name__ == "__main__":
    # Small shapes consistent with the module: batch=2, seq=8, hidden=32.
    B, S, D = 2, 8, 32
    eps = 1e-6
    alpha, bias = 0.9, 0.1  # scalar learnable params (module inits 1.0 / 0.0)

    key = jax.random.PRNGKey(0)
    kx, _ = jax.random.split(key)
    x = jax.random.normal(kx, (B, S, D), dtype=jnp.float32)
    mask = jnp.ones((B, 1, S, S), dtype=jnp.float32)  # consumed only by layers

    layers = ()  # opaque encoder blocks -> identity stack for the demo

    out = encoder_forward(x, mask, layers, alpha=alpha, bias=bias, eps=eps)
    out = jax.block_until_ready(out)

    # Pure-JAX reference of the module's LayerNormalization (unbiased std).
    mean = jnp.mean(x, axis=-1, keepdims=True)
    std = jnp.std(x, axis=-1, keepdims=True, ddof=1)
    ref = alpha * (x - mean) / (std + eps) + bias

    assert out.shape == (B, S, D)
    assert jnp.allclose(out, ref, atol=1e-5, rtol=1e-5), "mismatch vs reference"

    print("KERNEL_OK")
</pallas_src>

<mosaic_0001>
module attributes {stable_mosaic.version = 11 : i64} {
  func.func @_layernorm_kernel(%arg0: i32, %arg1: memref<2xf32, #tpu.memory_space<smem>>, %arg2: memref<16x32xf32, #tpu.memory_space<vmem>>, %arg3: memref<16x32xf32, #tpu.memory_space<vmem>>) attributes {dimension_semantics = [#tpu.dimension_semantics<parallel>], iteration_bounds = array<i64: 1>, scalar_prefetch = 0 : i64, scratch_operands = 0 : i64, tpu.core_type = #tpu.core_type<tc>, window_params = [{transform_indices = @transform_0, window_bounds = array<i64: 2>}, {transform_indices = @transform_1, window_bounds = array<i64: 16, 32>}, {transform_indices = @transform_2, window_bounds = array<i64: 16, 32>}]} {
    %c0 = arith.constant 0 : index
    %c0_0 = arith.constant 0 : index
    %0 = vector.load %arg2[%c0, %c0_0] : memref<16x32xf32, #tpu.memory_space<vmem>>, vector<16x32xf32>
    %cst = arith.constant dense<0.000000e+00> : vector<16xf32>
    %1 = vector.multi_reduction <add>, %0, %cst [1] : vector<16x32xf32> to vector<16xf32>
    %2 = vector.shape_cast %1 : vector<16xf32> to vector<16x1xf32>
    %cst_1 = arith.constant 3.200000e+01 : f32
    %3 = vector.broadcast %cst_1 : f32 to vector<16x1xf32>
    %4 = arith.divf %2, %3 : vector<16x1xf32>
    %5 = vector.broadcast %4 : vector<16x1xf32> to vector<16x32xf32>
    %6 = arith.subf %0, %5 : vector<16x32xf32>
    %7 = arith.mulf %6, %6 : vector<16x32xf32>
    %cst_2 = arith.constant dense<0.000000e+00> : vector<16xf32>
    %8 = vector.multi_reduction <add>, %7, %cst_2 [1] : vector<16x32xf32> to vector<16xf32>
    %9 = vector.shape_cast %8 : vector<16xf32> to vector<16x1xf32>
    %cst_3 = arith.constant 0.0322580636 : f32
    %10 = vector.broadcast %cst_3 : f32 to vector<16x1xf32>
    %11 = arith.mulf %9, %10 : vector<16x1xf32>
    %12 = math.sqrt %11 : vector<16x1xf32>
    %c0_4 = arith.constant 0 : index
    %13 = memref.load %arg1[%c0_4] : memref<2xf32, #tpu.memory_space<smem>>
    %c1 = arith.constant 1 : index
    %14 = memref.load %arg1[%c1] : memref<2xf32, #tpu.memory_space<smem>>
    %cst_5 = arith.constant 9.99999997E-7 : f32
    %15 = vector.broadcast %cst_5 : f32 to vector<16x1xf32>
    %16 = arith.addf %12, %15 : vector<16x1xf32>
    %17 = vector.broadcast %13 : f32 to vector<16x1xf32>
    %18 = arith.divf %17, %16 : vector<16x1xf32>
    %19 = vector.broadcast %18 : vector<16x1xf32> to vector<16x32xf32>
    %20 = arith.mulf %6, %19 : vector<16x32xf32>
    %21 = vector.broadcast %14 : f32 to vector<16x32xf32>
    %22 = arith.addf %20, %21 : vector<16x32xf32>
    %c0_6 = arith.constant 0 : index
    %c0_7 = arith.constant 0 : index
    %23 = vector.load %arg3[%c0_6, %c0_7] : memref<16x32xf32, #tpu.memory_space<vmem>>, vector<16x32xf32>
    tpu.vector_store %arg3[%c0_6, %c0_7], %22 {strides = array<i32>} : memref<16x32xf32, #tpu.memory_space<vmem>>, vector<16x32xf32>,
    return
  }
  func.func @transform_0(%arg0: i32) -> i32 {
    %c0_i32 = arith.constant 0 : i32
    %c0_i32_0 = arith.constant 0 : i32
    return %c0_i32 : i32
  }
  func.func @transform_1(%arg0: i32) -> (i32, i32) {
    %c0_i32 = arith.constant 0 : i32
    %c0_i32_0 = arith.constant 0 : i32
    return %arg0, %c0_i32 : i32, i32
  }
  func.func @transform_2(%arg0: i32) -> (i32, i32) {
    %c0_i32 = arith.constant 0 : i32
    %c0_i32_0 = arith.constant 0 : i32
    return %arg0, %c0_i32 : i32, i32
  }
}

</mosaic_0001>

<bundles_post_ra>
// kernel: tpu_custom_call.1
= control target key start
LH: loop header
LB: loop body
LE: loop exit
PB: predicated region body
PF: predicated region fallthrough
CT: control target
= control target key end

     0   :  { %7 = vsyncpa [#allocation5], 0  ;;  %s251_s0 = inlined_call_operand.hbm [shape: f32[2], index: 0, kind: input, shape index: {}]   ;;  %s252_s1 = inlined_call_operand.hbm [shape: f32[16,32], index: 1, kind: input, shape index: {}]   ;;  %s253_s2 = inlined_call_operand.hbm [shape: f32[16,32], index: 2, kind: output, shape index: {}]  }
   0x1   :  { %8 = vsyncpa [#allocation3], 0 }
   0x2   :  { %9 = vsyncpa [#allocation4], 0  ;;  %s123_s11 = scalar_lea.hbm %s251_s0, 16 }
   0x3   :  { %p124_p0 = scmp.ne.s32.totalorder %s251_s0, %s123_s11  ;;  %p127_p1 = scmp.lt.u32.totalorder %s123_s11, %s251_s0 }
   0x5   :  { %p129_p2 = pnand %p127_p1, %p124_p0 }
   0x7   :  { %132 = shalt.err (!%p129_p2)
}
   0x8   :  { %s183_s16 = smov [#allocation2]   ;;  %s184_s19 = smov [#allocation6]  }
   0x9   :  { %17 = dma.hbm_to_smem %s251_s0, 16, %s183_s16, [#allocation5]  }
   0xa   :  { %s23_s20 = sshll.u32 %s184_s19, 4  ;;  %s133_s23 = scalar_lea.hbm %s252_s1, 256  ;;  %s24_s20 = int_to_ptr.vmem [resolvable:$true] %s23_s20 }
   0xb   :  { %p134_p3 = scmp.ne.s32.totalorder %s252_s1, %s133_s23  ;;  %p137_p4 = scmp.lt.u32.totalorder %s133_s23, %s252_s1 }
   0xd   :  { %p139_p5 = pnand %p137_p4, %p134_p3 }
   0xf   :  { %142 = shalt.err (!%p139_p5)
}
  0x10   :  { %s143_s28 = scalar_lea.vmem %s24_s20, 256  ;;  %p148_p7 = scmp.lt.s32.totalorder %s24_s20, %s24_s20 }
  0x11   :  { %p144_p6 = scmp.ne.s32.totalorder %s24_s20, %s143_s28  ;;  %p149_p8 = scmp.lt.s32.totalorder %s143_s28, %s143_s28 }
  0x13   :  { %p150_p9 = por %p149_p8, %p148_p7 }
  0x15   :  { %p151_p10 = pnand %p150_p9, %p144_p6 }
  0x17   :  { %154 = shalt.err (!%p151_p10)
}
  0x18   :  { %s185_s0 = smov 128   ;;  %s186_s29 = smov 8  }
  0x19   :  { %29 = dma.hbm_to_vmem [thread:$0]  %s252_s1, 256, %s24_s20, [#allocation3], %s185_s0, %s185_s0, %s186_s29  }
  0x1a   :  { %177 = dma.done.wait [#allocation5], 16  }
  0x1b   :  { %178 = vsyncadd [#allocation5], 4294967280 }
  0x1c   :  { %179 = dma.done.wait [#allocation3], 256  }
  0x1d   :  { %180 = vsyncadd [#allocation3], 4294967040 }
  0x1e   :  { %36 = sfence }
  0x1f   :  { %v37_v0 = vld [vmem:[#allocation6] sm:$0xff]  ;;  %vm39_vm0 = vcmask 261120   ;;  %v38_v1 = vld [vmem:[#allocation6 + $0x8] sm:$0xff]  ;;  %s75_s1 = sld [smem:[#allocation2]]  ;;  %s109_s4 = sld [smem:[#allocation2 + $0x1]] }
  0x20   :  { %v40_v2 = vsel %vm39_vm0, %v37_v0, 0.0  ;;  %v43_v3 = vsel %vm39_vm0, %v38_v1, 0.0  ;;  %s187_s5 = smov [#allocation7]  }
  0x21   :  { %41 = vadd.xlane.f32.xlu0 %v40_v2  ;;  %s96_s6 = sshll.u32 %s187_s5, 4  ;;  %s97_s6 = int_to_ptr.vmem [resolvable:$true] %s96_s6 }
  0x22   :  { %s155_s7 = scalar_lea.vmem %s97_s6, 256  ;;  %p160_p12 = scmp.lt.s32.totalorder %s97_s6, %s97_s6 }
  0x23   :  { %p156_p11 = scmp.ne.s32.totalorder %s97_s6, %s155_s7  ;;  %p161_p13 = scmp.lt.s32.totalorder %s155_s7, %s155_s7 }
  0x25   :  { %44 = vadd.xlane.f32.xlu0 %v43_v3  ;;  %v79_v30 = vstv %s75_s1  ;;  %v86_v33 = vstv %s109_s4  ;;  %p162_p0 = por %p161_p13, %p160_p12 }
  0x27   :  { %p163_p1 = pnand %p162_p0, %p156_p11 }
  0xae   :  { %v42_v4 = vpop.xlane.xlu0 %41 }
  0xaf   :  { %v47_v5 = vmul.f32 0.03125, %v42_v4 }
  0xb1   :  { %v49_v6 = vsub.f32 %v37_v0, %v47_v5 }
  0xb2   :  { %v45_v7 = vpop.xlane.xlu0 %44 }
  0xb3   :  { %v48_v8 = vmul.f32 0.03125, %v45_v7  ;;  %v51_v9 = vmul.f32 %v49_v6, %v49_v6 }
  0xb5   :  { %v50_v10 = vsub.f32 %v38_v1, %v48_v8  ;;  %v53_v11 = vsel %vm39_vm0, %v51_v9, 0.0 }
  0xb6   :  { %54 = vadd.xlane.f32.xlu1 %v53_v11 }
  0xb7   :  { %v52_v12 = vmul.f32 %v50_v10, %v50_v10 }
  0xb9   :  { %v56_v13 = vsel %vm39_vm0, %v52_v12, 0.0 }
  0xba   :  { %57 = vadd.xlane.f32.xlu1 %v56_v13 }
 0x143   :  { %v55_v14 = vpop.xlane.xlu1 %54 }
 0x144   :  { %v59_v15 = vmul.f32 0.032258064, %v55_v14 }
 0x146   :  { %115 = vrsqrt.f32 %v59_v15  ;;  %vm63_vm1 = vcmp.eq.f32.partialorder %v59_v15, inf  ;;  %v66_v20 = vand.u32 2147483648, %v59_v15  ;;  %vm65_vm2 = vcmp.eq.f32.partialorder %v59_v15, 0.0 }
 0x147   :  { %v58_v16 = vpop.xlane.xlu1 %57 }
 0x148   :  { %v60_v17 = vmul.f32 0.032258064, %v58_v16 }
 0x14a   :  { %117 = vrsqrt.f32 %v60_v17  ;;  %vm70_vm3 = vcmp.eq.f32.partialorder %v60_v17, inf  ;;  %v73_v26 = vand.u32 2147483648, %v60_v17  ;;  %vm72_vm4 = vcmp.eq.f32.partialorder %v60_v17, 0.0 }
 0x150   :  { %v116_v18 = vpop.eup %115 }
 0x151   :  { %v62_v19 = vmul.f32 %v116_v18, %v59_v15 }
 0x153   :  { %v64_v21 = vsel %vm63_vm1, %v59_v15, %v62_v19 }
 0x154   :  { %v118_v22 = vpop.eup %117  ;;  %v67_v23 = vsel %vm65_vm2, %v66_v20, %v64_v21 }
 0x155   :  { %v69_v24 = vmul.f32 %v118_v22, %v60_v17  ;;  %v77_v25 = vadd.f32 1e-06, %v67_v23 }
 0x157   :  { %v71_v27 = vsel %vm70_vm3, %v60_v17, %v69_v24  ;;  %119 = vrcp.f32 %v77_v25 }
 0x158   :  { %v74_v28 = vsel %vm72_vm4, %v73_v26, %v71_v27 }
 0x159   :  { %v78_v29 = vadd.f32 1e-06, %v74_v28 }
 0x15b   :  { %121 = vrcp.f32 %v78_v29 }
 0x161   :  { %v120_v31 = vpop.eup %119 }
 0x162   :  { %v81_v32 = vmul.f32 %v120_v31, %v79_v30 }
 0x164   :  { %v84_v34 = vmul.f32 %v81_v32, %v49_v6 }
 0x165   :  { %v122_v35 = vpop.eup %121 }
 0x166   :  { %v83_v36 = vmul.f32 %v122_v35, %v79_v30  ;;  %v87_v37 = vadd.f32 %v86_v33, %v84_v34 }
 0x168   :  { %v85_v38 = vmul.f32 %v83_v36, %v50_v10  ;;  %89 = vst.msk [vmem:[#allocation7] sm:$0xff] %vm39_vm0, %v87_v37 }
 0x16a   :  { %v88_v39 = vadd.f32 %v86_v33, %v85_v38 }
 0x16c   :  { %90 = vst.msk [vmem:[#allocation7 + $0x8] sm:$0xff] %vm39_vm0, %v88_v39 }
 0x16d   :  { %166 = shalt.err (!%p163_p1)
}
 0x16e   :  { %s167_s10 = scalar_lea.hbm %s253_s2, 256 }
 0x16f   :  { %p168_p2 = scmp.ne.s32.totalorder %s253_s2, %s167_s10  ;;  %p171_p3 = scmp.lt.u32.totalorder %s167_s10, %s253_s2 }
 0x171   :  { %p173_p4 = pnand %p171_p3, %p168_p2 }
 0x173   :  { %176 = shalt.err (!%p173_p4)
}
 0x174   :  { %102 = dma.vmem_to_hbm [thread:$0]  %s97_s6, 256, %s253_s2, [#allocation4], %s185_s0, %s185_s0, %s186_s29  }
 0x175   :  { %181 = dma.done.wait [#allocation4], 256  }
 0x176   :  { %182 = vsyncadd [#allocation4], 4294967040 }
 0x177   :  { %106 = vsyncpa [#allocation3], 1 }
 0x178   :  { %107 = vsyncpa [#allocation4], 1 }
 0x179   :  { %108 = vsyncpa [#allocation5], 1 }

</bundles_post_ra>
